<compile_context>
chip_gen: v7x
topology: tpu7x:2x2x1
jax: 0.10.0
libtpu: 0.0.40
codegen_flags: <defaults>
</compile_context>

<pallas_src>
import functools

import jax
import jax.numpy as jnp
from jax import lax
from jax.experimental import pallas as pl
from jax.experimental.pallas import tpu as pltpu


def _layernorm(x, gamma, beta, eps=1e-5):
    mu = jnp.mean(x, axis=-1, keepdims=True)
    var = jnp.mean((x - mu) ** 2, axis=-1, keepdims=True)
    return (x - mu) * lax.rsqrt(var + eps) * gamma + beta


def block_kernel(x_ref, g1_ref, b1_ref, g2_ref, b2_ref,
                 wqkv_ref, wp_ref, bp_ref, w1_ref, bf1_ref, w2_ref, bf2_ref,
                 o_ref, *, num_heads):
    bf16 = jnp.bfloat16
    x = x_ref[...]                                   # (T, C) f32 — one batch element per grid step
    T, C = x.shape
    H = num_heads
    hs = C // H

    # ---- x + MultiHeadAttention(LayerNorm1(x)) ----
    ln1 = _layernorm(x, g1_ref[...], b1_ref[...])

    # Fused Q/K/V projection: one MXU dot (bf16 operands, f32 accumulation).
    # 1/sqrt(hs) is already folded into the Q columns of wqkv (parameter prep).
    qkv = jnp.dot(ln1.astype(bf16), wqkv_ref[...],
                  preferred_element_type=jnp.float32)            # (T, 3C)

    q2 = qkv[:, 0 * C:1 * C]
    k2 = qkv[:, 1 * C:2 * C]
    v2 = qkv[:, 2 * C:3 * C]

    # Head split: a single reshape + transpose per tensor (no per-head concatenates).
    def heads_first(t2):                              # (T, C) -> (H, T, hs)
        return jnp.transpose(t2.reshape(T, H, hs), (1, 0, 2))

    qh = heads_first(q2).astype(bf16)
    kh = heads_first(k2).astype(bf16)
    vh = heads_first(v2).astype(bf16)

    # Batched (over heads) score matmul, f32 accumulation.
    s = jnp.einsum("hqd,hkd->hqk", qh, kh,
                   preferred_element_type=jnp.float32)           # (H, T, T)

    # Causal mask: finite -1e30 bias (no -inf -> NaN hazard).
    rows = lax.broadcasted_iota(jnp.int32, (T, T), 0)
    cols = lax.broadcasted_iota(jnp.int32, (T, T), 1)
    s = s + jnp.where(rows >= cols, 0.0, -1e30)

    # Softmax kept in f32 (v5e VPU/EUP have no bf16 path); divide via EUP reciprocal.
    s = s - jnp.max(s, axis=-1, keepdims=True)
    p = jnp.exp(s)
    p = p * pl.reciprocal(jnp.sum(p, axis=-1, keepdims=True), approx=True)

    oh = jnp.einsum("hqk,hkd->hqd", p.astype(bf16), vh,
                    preferred_element_type=jnp.float32)          # (H, T, hs)

    # Re-pack heads column-wise (head h owns columns [h*hs,(h+1)*hs)) — one transpose + reshape.
    attn = jnp.transpose(oh, (1, 0, 2)).reshape(T, C)

    attn = jnp.dot(attn.astype(bf16), wp_ref[...],
                   preferred_element_type=jnp.float32) + bp_ref[...]

    x1 = x + attn

    # ---- x1 + FeedForward(LayerNorm2(x1)) ----
    ln2 = _layernorm(x1, g2_ref[...], b2_ref[...])
    # Cast the (T, 4C) activation to bf16 immediately (largest non-attention intermediate).
    h1 = jnp.maximum(
        jnp.dot(ln2.astype(bf16), w1_ref[...], preferred_element_type=jnp.float32)
        + bf1_ref[...], 0.0).astype(bf16)
    ff = jnp.dot(h1, w2_ref[...], preferred_element_type=jnp.float32) + bf2_ref[...]

    # NOTE: at demo C=32 the output last dim is < 128 lanes (masked stores); at realistic
    # C (>=128) this store is lane-dense as-is.
    o_ref[...] = (x1 + ff).astype(o_ref.dtype)


def prepare_block_params(params, num_heads):
    """One-time parameter prep (hoisted out of the per-call path):
    fuse Q/K/V into a single (C, 3C) weight, fold the 1/sqrt(hs) attention scale into the
    Q columns, and cast all matmul weights to bf16 (accumulation stays f32 in-kernel)."""
    (g1, b1, g2, b2, wq, wk, wv, wp, bp, w1, bf1, w2, bf2) = params
    C = wq.shape[0]
    hs = C // num_heads
    scale = float(hs) ** -0.5
    wqkv = jnp.concatenate([wq * scale, wk, wv], axis=1).astype(jnp.bfloat16)
    return (g1, b1, g2, b2, wqkv,
            wp.astype(jnp.bfloat16), bp,
            w1.astype(jnp.bfloat16), bf1,
            w2.astype(jnp.bfloat16), bf2)


def transformer_block(x, prepared_params, num_heads):
    (g1, b1, g2, b2, wqkv, wp_b, bp, w1_b, bf1, w2_b, bf2) = prepared_params
    B, T, C = x.shape

    x2 = x.reshape(B * T, C)

    full2d = lambda arr: pl.BlockSpec(arr.shape, lambda b: (0, 0))
    in_specs = [
        pl.BlockSpec((T, C), lambda b: (b, 0)),    # x tile: one batch element per grid step
        full2d(g1), full2d(b1), full2d(g2), full2d(b2),
        full2d(wqkv), full2d(wp_b), full2d(bp),
        full2d(w1_b), full2d(bf1), full2d(w2_b), full2d(bf2),
    ]
    out_specs = pl.BlockSpec((T, C), lambda b: (b, 0))

    kernel = functools.partial(block_kernel, num_heads=num_heads)
    out = pl.pallas_call(
        kernel,
        out_shape=jax.ShapeDtypeStruct((B * T, C), jnp.float32),
        grid=(B,),
        in_specs=in_specs,
        out_specs=out_specs,
        compiler_params=pltpu.CompilerParams(
            dimension_semantics=("parallel",),       # megacore sharding on v7x
            vmem_limit_bytes=32 * 1024 * 1024,
        ),
    )(x2, g1, b1, g2, b2, wqkv, wp_b, bp, w1_b, bf1, w2_b, bf2)
    return out.reshape(B, T, C)


def reference_block(x, params, num_heads):
    (g1, b1, g2, b2, wq, wk, wv, wp, bp, w1, bf1, w2, bf2) = params
    B, T, C = x.shape
    hs = C // num_heads

    def ln(z, g, b):
        mu = jnp.mean(z, axis=-1, keepdims=True)
        var = jnp.mean((z - mu) ** 2, axis=-1, keepdims=True)
        return (z - mu) / jnp.sqrt(var + 1e-5) * g[0] + b[0]

    l1 = ln(x, g1, b1)
    q = l1 @ wq
    k = l1 @ wk
    v = l1 @ wv
    q = q.reshape(B, T, num_heads, hs).transpose(0, 2, 1, 3)
    k = k.reshape(B, T, num_heads, hs).transpose(0, 2, 1, 3)
    v = v.reshape(B, T, num_heads, hs).transpose(0, 2, 1, 3)
    s = jnp.einsum("bhqd,bhkd->bhqk", q, k) * (hs ** -0.5)
    mask = jnp.tril(jnp.ones((T, T), bool))
    s = jnp.where(mask, s, -jnp.inf)
    p = jax.nn.softmax(s, axis=-1)
    o = jnp.einsum("bhqk,bhkd->bhqd", p, v).transpose(0, 2, 1, 3).reshape(B, T, C)
    o = o @ wp + bp[0]
    x1 = x + o
    l2 = ln(x1, g2, b2)
    ff = jnp.maximum(l2 @ w1 + bf1[0], 0.0) @ w2 + bf2[0]
    return x1 + ff


if __name__ == "__main__":
    B, T, C = 2, 8, 32          # batch, blockSize(tokens), embeddingDims
    num_heads = 4

    key = jax.random.PRNGKey(0)
    ks = jax.random.split(key, 10)

    x = jax.random.normal(ks[0], (B, T, C), jnp.float32)

    # LayerNorm params (PyTorch default init: weight=1, bias=0)
    g1 = jnp.ones((1, C), jnp.float32)
    b1 = jnp.zeros((1, C), jnp.float32)
    g2 = jnp.ones((1, C), jnp.float32)
    b2 = jnp.zeros((1, C), jnp.float32)

    s = 0.05
    wq = s * jax.random.normal(ks[1], (C, C), jnp.float32)       # packed per-head Q
    wk = s * jax.random.normal(ks[2], (C, C), jnp.float32)       # packed per-head K
    wv = s * jax.random.normal(ks[3], (C, C), jnp.float32)       # packed per-head V
    wp = s * jax.random.normal(ks[4], (C, C), jnp.float32)       # output projection
    bp = s * jax.random.normal(ks[5], (1, C), jnp.float32)
    w1 = s * jax.random.normal(ks[6], (C, 4 * C), jnp.float32)   # FF expand
    bf1 = s * jax.random.normal(ks[7], (1, 4 * C), jnp.float32)
    w2 = s * jax.random.normal(ks[8], (4 * C, C), jnp.float32)   # FF contract
    bf2 = s * jax.random.normal(ks[9], (1, C), jnp.float32)

    params = (g1, b1, g2, b2, wq, wk, wv, wp, bp, w1, bf1, w2, bf2)

    # One-time parameter prep (fused QKV, scale fold, bf16 casts) — outside the per-call path.
    prepared = jax.block_until_ready(prepare_block_params(params, num_heads))

    out = transformer_block(x, prepared, num_heads)
    out = jax.block_until_ready(out)

    ref = reference_block(x, params, num_heads)
    assert out.shape == (B, T, C)
    # bf16 MXU operands + approx reciprocal -> compare with a correspondingly relaxed tolerance.
    assert jnp.allclose(out, ref, atol=2e-2, rtol=2e-2), "mismatch vs JAX reference"

    print("KERNEL_OK")
</pallas_src>

<mosaic_0001>
module attributes {stable_mosaic.version = 11 : i64} {
  func.func @block_kernel(%arg0: i32, %arg1: memref<8x32xf32, #tpu.memory_space<vmem>>, %arg2: memref<1x32xf32, #tpu.memory_space<vmem>>, %arg3: memref<1x32xf32, #tpu.memory_space<vmem>>, %arg4: memref<1x32xf32, #tpu.memory_space<vmem>>, %arg5: memref<1x32xf32, #tpu.memory_space<vmem>>, %arg6: memref<32x96xbf16, #tpu.memory_space<vmem>>, %arg7: memref<32x32xbf16, #tpu.memory_space<vmem>>, %arg8: memref<1x32xf32, #tpu.memory_space<vmem>>, %arg9: memref<32x128xbf16, #tpu.memory_space<vmem>>, %arg10: memref<1x128xf32, #tpu.memory_space<vmem>>, %arg11: memref<128x32xbf16, #tpu.memory_space<vmem>>, %arg12: memref<1x32xf32, #tpu.memory_space<vmem>>, %arg13: memref<8x32xf32, #tpu.memory_space<vmem>>) attributes {dimension_semantics = [#tpu.dimension_semantics<parallel>], iteration_bounds = array<i64: 2>, scalar_prefetch = 0 : i64, scratch_operands = 0 : i64, tpu.core_type = #tpu.core_type<tc>, window_params = [{transform_indices = @transform_0, window_bounds = array<i64: 8, 32>}, {pipeline_mode = #tpu.pipeline_mode<synchronous>, transform_indices = @transform_1, window_bounds = array<i64: 1, 32>}, {pipeline_mode = #tpu.pipeline_mode<synchronous>, transform_indices = @transform_2, window_bounds = array<i64: 1, 32>}, {pipeline_mode = #tpu.pipeline_mode<synchronous>, transform_indices = @transform_3, window_bounds = array<i64: 1, 32>}, {pipeline_mode = #tpu.pipeline_mode<synchronous>, transform_indices = @transform_4, window_bounds = array<i64: 1, 32>}, {pipeline_mode = #tpu.pipeline_mode<synchronous>, transform_indices = @transform_5, window_bounds = array<i64: 32, 96>}, {pipeline_mode = #tpu.pipeline_mode<synchronous>, transform_indices = @transform_6, window_bounds = array<i64: 32, 32>}, {pipeline_mode = #tpu.pipeline_mode<synchronous>, transform_indices = @transform_7, window_bounds = array<i64: 1, 32>}, {pipeline_mode = #tpu.pipeline_mode<synchronous>, transform_indices = @transform_8, window_bounds = array<i64: 32, 128>}, {pipeline_mode = #tpu.pipeline_mode<synchronous>, transform_indices = @transform_9, window_bounds = array<i64: 1, 128>}, {pipeline_mode = #tpu.pipeline_mode<synchronous>, transform_indices = @transform_10, window_bounds = array<i64: 128, 32>}, {pipeline_mode = #tpu.pipeline_mode<synchronous>, transform_indices = @transform_11, window_bounds = array<i64: 1, 32>}, {transform_indices = @transform_12, window_bounds = array<i64: 8, 32>}]} {
    %c0 = arith.constant 0 : index
    %c0_0 = arith.constant 0 : index
    %0 = vector.load %arg1[%c0, %c0_0] : memref<8x32xf32, #tpu.memory_space<vmem>>, vector<8x32xf32>
    %c0_1 = arith.constant 0 : index
    %c0_2 = arith.constant 0 : index
    %1 = vector.load %arg2[%c0_1, %c0_2] : memref<1x32xf32, #tpu.memory_space<vmem>>, vector<1x32xf32>
    %c0_3 = arith.constant 0 : index
    %c0_4 = arith.constant 0 : index
    %2 = vector.load %arg3[%c0_3, %c0_4] : memref<1x32xf32, #tpu.memory_space<vmem>>, vector<1x32xf32>
    %cst = arith.constant dense<0.000000e+00> : vector<8xf32>
    %3 = vector.multi_reduction <add>, %0, %cst [1] : vector<8x32xf32> to vector<8xf32>
    %4 = vector.shape_cast %3 : vector<8xf32> to vector<8x1xf32>
    %cst_5 = arith.constant 3.200000e+01 : f32
    %5 = vector.broadcast %cst_5 : f32 to vector<8x1xf32>
    %6 = arith.divf %4, %5 : vector<8x1xf32>
    %7 = vector.broadcast %6 : vector<8x1xf32> to vector<8x32xf32>
    %8 = arith.subf %0, %7 : vector<8x32xf32>
    %9 = arith.mulf %8, %8 : vector<8x32xf32>
    %cst_6 = arith.constant dense<0.000000e+00> : vector<8xf32>
    %10 = vector.multi_reduction <add>, %9, %cst_6 [1] : vector<8x32xf32> to vector<8xf32>
    %11 = vector.shape_cast %10 : vector<8xf32> to vector<8x1xf32>
    %cst_7 = arith.constant 3.200000e+01 : f32
    %12 = vector.broadcast %cst_7 : f32 to vector<8x1xf32>
    %13 = arith.divf %11, %12 : vector<8x1xf32>
    %14 = vector.broadcast %6 : vector<8x1xf32> to vector<8x32xf32>
    %15 = arith.subf %0, %14 : vector<8x32xf32>
    %cst_8 = arith.constant 9.99999974E-6 : f32
    %16 = vector.broadcast %cst_8 : f32 to vector<8x1xf32>
    %17 = arith.addf %13, %16 : vector<8x1xf32>
    %18 = math.rsqrt %17 : vector<8x1xf32>
    %19 = vector.broadcast %18 : vector<8x1xf32> to vector<8x32xf32>
    %20 = arith.mulf %15, %19 : vector<8x32xf32>
    %21 = vector.broadcast %1 : vector<1x32xf32> to vector<8x32xf32>
    %22 = arith.mulf %20, %21 : vector<8x32xf32>
    %23 = vector.broadcast %2 : vector<1x32xf32> to vector<8x32xf32>
    %24 = arith.addf %22, %23 : vector<8x32xf32>
    %25 = arith.truncf %24 : vector<8x32xf32> to vector<8x32xbf16>
    %c0_9 = arith.constant 0 : index
    %c0_10 = arith.constant 0 : index
    %26 = vector.load %arg6[%c0_9, %c0_10] : memref<32x96xbf16, #tpu.memory_space<vmem>>, vector<32x96xbf16>
    %cst_11 = arith.constant dense<0.000000e+00> : vector<8x96xf32>
    %27 = tpu.matmul %25, %26, %cst_11 {dimension_numbers = #tpu.dot_dimension_numbers<[1], [0], [0], [1], [0, 0, 1, 1], [], []>} : vector<8x32xbf16>, vector<32x96xbf16>, vector<8x96xf32> -> vector<8x96xf32>
    %28 = vector.extract_strided_slice %27 {offsets = [0, 0], sizes = [8, 32], strides = [1, 1]} : vector<8x96xf32> to vector<8x32xf32>
    %29 = vector.extract_strided_slice %27 {offsets = [0, 32], sizes = [8, 32], strides = [1, 1]} : vector<8x96xf32> to vector<8x32xf32>
    %30 = vector.extract_strided_slice %27 {offsets = [0, 64], sizes = [8, 32], strides = [1, 1]} : vector<8x96xf32> to vector<8x32xf32>
    %31 = vector.shape_cast %28 : vector<8x32xf32> to vector<8x4x8xf32>
    %32 = tpu.transpose %31, [1, 0, 2] : vector<8x4x8xf32> -> vector<4x8x8xf32>
    %33 = arith.truncf %32 : vector<4x8x8xf32> to vector<4x8x8xbf16>
    %34 = vector.shape_cast %29 : vector<8x32xf32> to vector<8x4x8xf32>
    %35 = tpu.transpose %34, [1, 0, 2] : vector<8x4x8xf32> -> vector<4x8x8xf32>
    %36 = arith.truncf %35 : vector<4x8x8xf32> to vector<4x8x8xbf16>
    %37 = vector.shape_cast %30 : vector<8x32xf32> to vector<8x4x8xf32>
    %38 = tpu.transpose %37, [1, 0, 2] : vector<8x4x8xf32> -> vector<4x8x8xf32>
    %39 = arith.truncf %38 : vector<4x8x8xf32> to vector<4x8x8xbf16>
    "tpu.trace_start"() <{level = 10 : i32, message = "hqd,hkd->hqk"}> : () -> ()
    %cst_12 = arith.constant dense<0.000000e+00> : vector<4x8x8xf32>
    %40 = tpu.matmul %33, %36, %cst_12 {dimension_numbers = #tpu.dot_dimension_numbers<[2], [2], [1], [1], [0, 0, 0, 1, 1, 1], [0], [0]>} : vector<4x8x8xbf16>, vector<4x8x8xbf16>, vector<4x8x8xf32> -> vector<4x8x8xf32>
    "tpu.trace_stop"() : () -> ()
    %41 = tpu.iota {dimensions = array<i32: 0>} : vector<8x8xi32>
    %42 = tpu.iota {dimensions = array<i32: 1>} : vector<8x8xi32>
    %43 = arith.cmpi sge, %41, %42 : vector<8x8xi32>
    %cst_13 = arith.constant 0.000000e+00 : f32
    %cst_14 = arith.constant -1.000000e+30 : f32
    %44 = vector.broadcast %cst_13 : f32 to vector<8x8xf32>
    %45 = vector.broadcast %cst_14 : f32 to vector<8x8xf32>
    %46 = arith.select %43, %44, %45 : vector<8x8xi1>, vector<8x8xf32>
    %47 = vector.shape_cast %46 : vector<8x8xf32> to vector<1x8x8xf32>
    %48 = vector.broadcast %47 : vector<1x8x8xf32> to vector<4x8x8xf32>
    %49 = arith.addf %40, %48 : vector<4x8x8xf32>
    %cst_15 = arith.constant dense<0xFF800000> : vector<4x8xf32>
    %50 = vector.multi_reduction <maximumf>, %49, %cst_15 [2] : vector<4x8x8xf32> to vector<4x8xf32>
    %51 = vector.shape_cast %50 : vector<4x8xf32> to vector<4x8x1xf32>
    %52 = vector.broadcast %51 : vector<4x8x1xf32> to vector<4x8x8xf32>
    %53 = arith.subf %49, %52 : vector<4x8x8xf32>
    %54 = math.exp %53 : vector<4x8x8xf32>
    %cst_16 = arith.constant dense<0.000000e+00> : vector<4x8xf32>
    %55 = vector.multi_reduction <add>, %54, %cst_16 [2] : vector<4x8x8xf32> to vector<4x8xf32>
    %56 = vector.shape_cast %55 : vector<4x8xf32> to vector<4x8x1xf32>
    %57 = tpu.reciprocal %56 {approx = true} : vector<4x8x1xf32> -> vector<4x8x1xf32>
    %58 = vector.broadcast %57 : vector<4x8x1xf32> to vector<4x8x8xf32>
    %59 = arith.mulf %54, %58 : vector<4x8x8xf32>
    %60 = arith.truncf %59 : vector<4x8x8xf32> to vector<4x8x8xbf16>
    "tpu.trace_start"() <{level = 10 : i32, message = "hqk,hkd->hqd"}> : () -> ()
    %cst_17 = arith.constant dense<0.000000e+00> : vector<4x8x8xf32>
    %61 = tpu.matmul %60, %39, %cst_17 {dimension_numbers = #tpu.dot_dimension_numbers<[2], [1], [1], [2], [0, 0, 0, 1, 1, 2], [0], [0]>} : vector<4x8x8xbf16>, vector<4x8x8xbf16>, vector<4x8x8xf32> -> vector<4x8x8xf32>
    "tpu.trace_stop"() : () -> ()
    %62 = tpu.transpose %61, [1, 0, 2] : vector<4x8x8xf32> -> vector<8x4x8xf32>
    %63 = vector.shape_cast %62 : vector<8x4x8xf32> to vector<8x32xf32>
    %64 = arith.truncf %63 : vector<8x32xf32> to vector<8x32xbf16>
    %c0_18 = arith.constant 0 : index
    %c0_19 = arith.constant 0 : index
    %65 = vector.load %arg7[%c0_18, %c0_19] : memref<32x32xbf16, #tpu.memory_space<vmem>>, vector<32x32xbf16>
    %cst_20 = arith.constant dense<0.000000e+00> : vector<8x32xf32>
    %66 = tpu.matmul %64, %65, %cst_20 {dimension_numbers = #tpu.dot_dimension_numbers<[1], [0], [0], [1], [0, 0, 1, 1], [], []>} : vector<8x32xbf16>, vector<32x32xbf16>, vector<8x32xf32> -> vector<8x32xf32>
    %c0_21 = arith.constant 0 : index
    %c0_22 = arith.constant 0 : index
    %67 = vector.load %arg8[%c0_21, %c0_22] : memref<1x32xf32, #tpu.memory_space<vmem>>, vector<1x32xf32>
    %68 = vector.broadcast %67 : vector<1x32xf32> to vector<8x32xf32>
    %69 = arith.addf %66, %68 : vector<8x32xf32>
    %70 = arith.addf %0, %69 : vector<8x32xf32>
    %c0_23 = arith.constant 0 : index
    %c0_24 = arith.constant 0 : index
    %71 = vector.load %arg4[%c0_23, %c0_24] : memref<1x32xf32, #tpu.memory_space<vmem>>, vector<1x32xf32>
    %c0_25 = arith.constant 0 : index
    %c0_26 = arith.constant 0 : index
    %72 = vector.load %arg5[%c0_25, %c0_26] : memref<1x32xf32, #tpu.memory_space<vmem>>, vector<1x32xf32>
    %cst_27 = arith.constant dense<0.000000e+00> : vector<8xf32>
    %73 = vector.multi_reduction <add>, %70, %cst_27 [1] : vector<8x32xf32> to vector<8xf32>
    %74 = vector.shape_cast %73 : vector<8xf32> to vector<8x1xf32>
    %cst_28 = arith.constant 3.200000e+01 : f32
    %75 = vector.broadcast %cst_28 : f32 to vector<8x1xf32>
    %76 = arith.divf %74, %75 : vector<8x1xf32>
    %77 = vector.broadcast %76 : vector<8x1xf32> to vector<8x32xf32>
    %78 = arith.subf %70, %77 : vector<8x32xf32>
    %79 = arith.mulf %78, %78 : vector<8x32xf32>
    %cst_29 = arith.constant dense<0.000000e+00> : vector<8xf32>
    %80 = vector.multi_reduction <add>, %79, %cst_29 [1] : vector<8x32xf32> to vector<8xf32>
    %81 = vector.shape_cast %80 : vector<8xf32> to vector<8x1xf32>
    %cst_30 = arith.constant 3.200000e+01 : f32
    %82 = vector.broadcast %cst_30 : f32 to vector<8x1xf32>
    %83 = arith.divf %81, %82 : vector<8x1xf32>
    %84 = vector.broadcast %76 : vector<8x1xf32> to vector<8x32xf32>
    %85 = arith.subf %70, %84 : vector<8x32xf32>
    %cst_31 = arith.constant 9.99999974E-6 : f32
    %86 = vector.broadcast %cst_31 : f32 to vector<8x1xf32>
    %87 = arith.addf %83, %86 : vector<8x1xf32>
    %88 = math.rsqrt %87 : vector<8x1xf32>
    %89 = vector.broadcast %88 : vector<8x1xf32> to vector<8x32xf32>
    %90 = arith.mulf %85, %89 : vector<8x32xf32>
    %91 = vector.broadcast %71 : vector<1x32xf32> to vector<8x32xf32>
    %92 = arith.mulf %90, %91 : vector<8x32xf32>
    %93 = vector.broadcast %72 : vector<1x32xf32> to vector<8x32xf32>
    %94 = arith.addf %92, %93 : vector<8x32xf32>
    %95 = arith.truncf %94 : vector<8x32xf32> to vector<8x32xbf16>
    %c0_32 = arith.constant 0 : index
    %c0_33 = arith.constant 0 : index
    %96 = vector.load %arg9[%c0_32, %c0_33] : memref<32x128xbf16, #tpu.memory_space<vmem>>, vector<32x128xbf16>
    %cst_34 = arith.constant dense<0.000000e+00> : vector<8x128xf32>
    %97 = tpu.matmul %95, %96, %cst_34 {dimension_numbers = #tpu.dot_dimension_numbers<[1], [0], [0], [1], [0, 0, 1, 1], [], []>} : vector<8x32xbf16>, vector<32x128xbf16>, vector<8x128xf32> -> vector<8x128xf32>
    %c0_35 = arith.constant 0 : index
    %c0_36 = arith.constant 0 : index
    %98 = vector.load %arg10[%c0_35, %c0_36] : memref<1x128xf32, #tpu.memory_space<vmem>>, vector<1x128xf32>
    %99 = vector.broadcast %98 : vector<1x128xf32> to vector<8x128xf32>
    %100 = arith.addf %97, %99 : vector<8x128xf32>
    %cst_37 = arith.constant 0.000000e+00 : f32
    %101 = vector.broadcast %cst_37 : f32 to vector<8x128xf32>
    %102 = arith.maximumf %100, %101 : vector<8x128xf32>
    %103 = arith.truncf %102 : vector<8x128xf32> to vector<8x128xbf16>
    %c0_38 = arith.constant 0 : index
    %c0_39 = arith.constant 0 : index
    %104 = vector.load %arg11[%c0_38, %c0_39] : memref<128x32xbf16, #tpu.memory_space<vmem>>, vector<128x32xbf16>
    %cst_40 = arith.constant dense<0.000000e+00> : vector<8x32xf32>
    %105 = tpu.matmul %103, %104, %cst_40 {dimension_numbers = #tpu.dot_dimension_numbers<[1], [0], [0], [1], [0, 0, 1, 1], [], []>} : vector<8x128xbf16>, vector<128x32xbf16>, vector<8x32xf32> -> vector<8x32xf32>
    %c0_41 = arith.constant 0 : index
    %c0_42 = arith.constant 0 : index
    %106 = vector.load %arg12[%c0_41, %c0_42] : memref<1x32xf32, #tpu.memory_space<vmem>>, vector<1x32xf32>
    %107 = vector.broadcast %106 : vector<1x32xf32> to vector<8x32xf32>
    %108 = arith.addf %105, %107 : vector<8x32xf32>
    %109 = arith.addf %70, %108 : vector<8x32xf32>
    %c0_43 = arith.constant 0 : index
    %c0_44 = arith.constant 0 : index
    %110 = vector.load %arg13[%c0_43, %c0_44] : memref<8x32xf32, #tpu.memory_space<vmem>>, vector<8x32xf32>
    tpu.vector_store %arg13[%c0_43, %c0_44], %109 {strides = array<i32>} : memref<8x32xf32, #tpu.memory_space<vmem>>, vector<8x32xf32>,
    return
  }
  func.func @transform_0(%arg0: i32) -> (i32, i32) {
    %c0_i32 = arith.constant 0 : i32
    %c0_i32_0 = arith.constant 0 : i32
    return %arg0, %c0_i32 : i32, i32
  }
  func.func @transform_1(%arg0: i32) -> (i32, i32) {
    %c0_i32 = arith.constant 0 : i32
    %c0_i32_0 = arith.constant 0 : i32
    %c0_i32_1 = arith.constant 0 : i32
    return %c0_i32, %c0_i32_0 : i32, i32
  }
  func.func @transform_2(%arg0: i32) -> (i32, i32) {
    %c0_i32 = arith.constant 0 : i32
    %c0_i32_0 = arith.constant 0 : i32
    %c0_i32_1 = arith.constant 0 : i32
    return %c0_i32, %c0_i32_0 : i32, i32
  }
  func.func @transform_3(%arg0: i32) -> (i32, i32) {
    %c0_i32 = arith.constant 0 : i32
    %c0_i32_0 = arith.constant 0 : i32
    %c0_i32_1 = arith.constant 0 : i32
    return %c0_i32, %c0_i32_0 : i32, i32
  }
  func.func @transform_4(%arg0: i32) -> (i32, i32) {
    %c0_i32 = arith.constant 0 : i32
    %c0_i32_0 = arith.constant 0 : i32
    %c0_i32_1 = arith.constant 0 : i32
    return %c0_i32, %c0_i32_0 : i32, i32
  }
  func.func @transform_5(%arg0: i32) -> (i32, i32) {
    %c0_i32 = arith.constant 0 : i32
    %c0_i32_0 = arith.constant 0 : i32
    %c0_i32_1 = arith.constant 0 : i32
    return %c0_i32, %c0_i32_0 : i32, i32
  }
  func.func @transform_6(%arg0: i32) -> (i32, i32) {
    %c0_i32 = arith.constant 0 : i32
    %c0_i32_0 = arith.constant 0 : i32
    %c0_i32_1 = arith.constant 0 : i32
    return %c0_i32, %c0_i32_0 : i32, i32
  }
  func.func @transform_7(%arg0: i32) -> (i32, i32) {
    %c0_i32 = arith.constant 0 : i32
    %c0_i32_0 = arith.constant 0 : i32
    %c0_i32_1 = arith.constant 0 : i32
    return %c0_i32, %c0_i32_0 : i32, i32
  }
  func.func @transform_8(%arg0: i32) -> (i32, i32) {
    %c0_i32 = arith.constant 0 : i32
    %c0_i32_0 = arith.constant 0 : i32
    %c0_i32_1 = arith.constant 0 : i32
    return %c0_i32, %c0_i32_0 : i32, i32
  }
  func.func @transform_9(%arg0: i32) -> (i32, i32) {
    %c0_i32 = arith.constant 0 : i32
    %c0_i32_0 = arith.constant 0 : i32
    %c0_i32_1 = arith.constant 0 : i32
    return %c0_i32, %c0_i32_0 : i32, i32
  }
  func.func @transform_10(%arg0: i32) -> (i32, i32) {
    %c0_i32 = arith.constant 0 : i32
    %c0_i32_0 = arith.constant 0 : i32
    %c0_i32_1 = arith.constant 0 : i32
    return %c0_i32, %c0_i32_0 : i32, i32
  }
  func.func @transform_11(%arg0: i32) -> (i32, i32) {
    %c0_i32 = arith.constant 0 : i32
    %c0_i32_0 = arith.constant 0 : i32
    %c0_i32_1 = arith.constant 0 : i32
    return %c0_i32, %c0_i32_0 : i32, i32
  }
  func.func @transform_12(%arg0: i32) -> (i32, i32) {
    %c0_i32 = arith.constant 0 : i32
    %c0_i32_0 = arith.constant 0 : i32
    return %arg0, %c0_i32 : i32, i32
  }
}

</mosaic_0001>

<bundles_post_ra>
// kernel: tpu_custom_call.1
= control target key start
LH: loop header
LB: loop body
LE: loop exit
PB: predicated region body
PF: predicated region fallthrough
CT: control target
= control target key end

     0   :  { %s2660_s0 = inlined_call_operand.vmem [shape: f32[16,32], index: 0, kind: input, shape index: {}]   ;;  %s2661_s1 = inlined_call_operand.vmem [shape: f32[1,32], index: 1, kind: input, shape index: {}]   ;;  %s2662_s2 = inlined_call_operand.vmem [shape: f32[1,32], index: 2, kind: input, shape index: {}]   ;;  %s2663_s3 = inlined_call_operand.vmem [shape: f32[1,32], index: 3, kind: input, shape index: {}]   ;;  %s2664_s4 = inlined_call_operand.vmem [shape: f32[1,32], index: 4, kind: input, shape index: {}]   ;;  %s2665_s5 = inlined_call_operand.vmem [shape: bf16[32,96], index: 5, kind: input, shape index: {}]   ;;  %s2666_s6 = inlined_call_operand.vmem [shape: bf16[32,32], index: 6, kind: input, shape index: {}]   ;;  %s2667_s7 = inlined_call_operand.vmem [shape: f32[1,32], index: 7, kind: input, shape index: {}]   ;;  %s2668_s8 = inlined_call_operand.vmem [shape: bf16[32,128], index: 8, kind: input, shape index: {}]   ;;  %s2669_s9 = inlined_call_operand.vmem [shape: f32[1,128], index: 9, kind: input, shape index: {}]   ;;  %s2670_s10 = inlined_call_operand.vmem [shape: bf16[128,32], index: 10, kind: input, shape index: {}]   ;;  %s2671_s11 = inlined_call_operand.vmem [shape: f32[1,32], index: 11, kind: input, shape index: {}]   ;;  %s2672_s12 = inlined_call_operand.hbm [shape: f32[16,32], index: 12, kind: output, shape index: {}]  }
   0x1   :  { %2673 = sst [smem:[#allocation5_spill]] %s2660_s0 }
   0x2   :  { %2674 = sst [smem:[#allocation6_spill]] %s2661_s1 }
   0x3   :  { %17 = vsyncpa [#allocation3], 0 }
   0x4   :  { %19 = vsyncpa [#allocation3 + $0x1], 0  ;;  %s2290_s21 = smov 0   ;;  %s2292_s22 = smov 0  }
   0x5   :  { %s2294_s23 = smov 0   ;;  %s2296_s24 = smov 0  }
   0x6 LB: > { %s2311_s25 = sadd.s32 4294967295, %s2209_s24   ;;  %s1885_s26 = sadd.s32 4294967294, %s2209_s24   ;;  %s2209_s24 = sphi %s2296_s24, %s2682_s24   ;;  %s2205_s23 = sphi %s2294_s23, %s2681_s23   ;;  %s2201_s22 = sphi %s2292_s22, %s2680_s22   ;;  %s2197_s21 = sphi %s2290_s21, %s2679_s21  }
   0x7   : > { %s2315_s27 = sadd.s32 1, %s2209_s24   ;;  %s289_s28 = sadd.s32 1, %s2205_s23 }
   0x8   : > { %s286_s29 = ssub.s32 %s2209_s24, %s2315_s27  ;;  %p299_p0 = scmp.ne.s32.totalorder %s2205_s23, %s2201_s22 }
   0x9   : > { %p287_p1 = scmp.eq.s32.totalorder %s286_s29, 0  ;;  %p300_p2 = scmp.eq.s32.totalorder %s2311_s25, 1 }
   0xa   : > { %p305_p3 = scmp.ne.s32.totalorder %s2201_s22, %s2197_s21  ;;  %p306_p4 = scmp.eq.s32.totalorder %s1885_s26, 1 }
   0xb   : > { %s2326_s30 = scalar_select %p287_p1, %s2205_s23, %s289_s28  }
   0xc   : > { %p2328_p5 = por %p300_p2, %p299_p0  ;;  %p2332_p6 = por %p306_p4, %p305_p3 }
   0xd   : > { %p1888_p7 = scmp.ge.s32.totalorder %s2209_s24, 1  ;;  %p364_p8 = scmp.lt.s32.totalorder %s2209_s24, 3 }
   0xf   : > { %p365_p9 = pnand %p1888_p7, %p364_p8 }
  0x10   : > { %p405_p10 = scmp.lt.s32.totalorder (!%p365_p9), %s2311_s25, 1  ;;  %vm413_vm0 = vcmask (!%p365_p9), 261120   ;;  %s2677_s0 = sld [smem:[#allocation5_spill]] (!%p365_p9)  ;;  %v2113_v7 = vld [vmem:[%s2665_s5] sm:$0xff] (!%p365_p9)   ;;  %v2211_v8 = vmov (!%p365_p9), 0.0   ;;  %vm2212_vm1 = vmmov (!%p365_p9), 0   ;;  %v517_v29 = vlaneseq (!%p365_p9) }
  0x11   : > { %368 = sbr.rel (%p365_p9) target bundleno = 2744 (0xab8), region = 68  ;;  %1969 = vmatprep.subr.bf16.mxu0 (!%p365_p9), %v2211_v8  ;;  %1973 = vmatprep.mubr.msk.bf16.mxu0 (!%p365_p9), %vm2212_vm1, %v2211_v8  ;;  %v2114_v9 = vld [vmem:[%s2665_s5 + $0x8] sm:$0xff] (!%p365_p9)   ;;  %s2678_s1 = sld [smem:[#allocation6_spill]] (!%p365_p9)  ;;  %v1892_v16 = vld [vmem:[%s2662_s2] ss:$0 sm:$0xff] (!%p365_p9)  ;;  %vm962_vm2 = vcmask (!%p365_p9), 64512  }
  0x12   : > { %1970 = vmatpush3.bf16.msra.mxu0 (!%p365_p9), %v2113_v7  ;;  %1989 = vmatprep.subr.bf16.mxu1 (!%p365_p9), %v2211_v8  ;;  %s2214_s20 = smov (!%p365_p9), 120   ;;  %s2215_s26 = smov (!%p365_p9), 112   ;;  %v2217_v27 = vmov (!%p365_p9), 1983009808   ;;  %v2388_v31 = vshrl.u32 (!%p365_p9), %v517_v29, 7  ;;  %vm1198_vm4 = vcmask (!%p365_p9), 1043456  }
  0x13   : > { %1971 = vmatprep.subr.bf16.mxu0 (!%p365_p9), %v2211_v8  ;;  %1991 = vmatprep.mubr.msk.bf16.mxu1 (!%p365_p9), %vm2212_vm1, %v2211_v8  ;;  %s2216_s28 = smov (!%p365_p9), 96   ;;  %v515_v28 = vunpack.c.l.s4 (!%p365_p9), %v2217_v27  ;;  %v2218_v33 = vmov (!%p365_p9), 1934713408   ;;  %s2220_s29 = smov (!%p365_p9), 64   ;;  %vm1529_vm5 = vcmask (!%p365_p9), 130048   ;;  %vm1531_vm6 = vcmask (!%p365_p9), 195584  }
  0x14   : > { %v547_v34 = vunpack.c.l.s4 (!%p365_p9), %v2218_v33  ;;  %s1932_s18 = sshll.u32 (!%p365_p9), %s2311_s25, 7 }
  0x15   : > { %v516_v30 = vunpack.c.0.s8 (!%p365_p9), %v515_v28 }
  0x16   : > { %1972 = vmatpush3.bf16.msra.mxu0 (!%p365_p9), %v2114_v9  ;;  %v548_v41 = vunpack.c.0.s8 (!%p365_p9), %v547_v34 }
  0x17   : > { %1977 = vmatprep.subr.bf16.mxu0 (!%p365_p9), %v2211_v8  ;;  %v1891_v14 = vld [vmem:[%s2678_s1] ss:$0 sm:$0xff] (!%p365_p9)  ;;  %v2395_v37 = vsub.s32 (!%p365_p9), %v516_v30, %v2388_v31 }
  0x18   : > { %s406_s15 = scalar_select %p405_p10, %s2311_s25, 1  ;;  %v2406_v47 = vsub.s32 %v548_v41, %v2388_v31 }
  0x1a   : > { %s1890_s16 = sshll.u32 %s406_s15, 3 }
  0x1b   : > { %s408_s19 = scalar_lea.vmem %s2677_s0, %s1890_s16  ;;  %s2617_s0 = scalar_lea.hbm %s2672_s12, %s1932_s18 }
  0x1c   : > { %v2343_v0 = vld [vmem:[%s408_s19] sm:$0xff]  ;;  %s2213_s19 = smov 104   ;;  %s2224_s16 = smov [#allocation2]  }
  0x1d   : > { %v414_v1 = vsel %vm413_vm0, %v2343_v0, 0.0  ;;  %s2151_s17 = sshll.u32 %s2224_s16, 4  ;;  %s2152_s17 = int_to_ptr.vmem [resolvable:$false] %s2151_s17 }
  0x1e   : > { %415 = vadd.xlane.f32.xlu0 %v414_v1  ;;  %s2153_s1 = scalar_lea.vmem %s2152_s17, 256 }
  0xab   : > { %v416_v2 = vpop.xlane.xlu0 %415 }
  0xac   : > { %v418_v3 = vmul.f32 0.03125, %v416_v2 }
  0xae   : > { %v419_v4 = vsub.f32 %v2343_v0, %v418_v3 }
  0xb0   : > { %v420_v5 = vmul.f32 %v419_v4, %v419_v4 }
  0xb2   : > { %v421_v6 = vsel %vm413_vm0, %v420_v5, 0.0 }
  0xb3   : > { %422 = vadd.xlane.f32.xlu0 %v421_v6 }
 0x140   : > { %v423_v10 = vpop.xlane.xlu0 %422 }
 0x141   : > { %v424_v11 = vmul.f32 0.03125, %v423_v10 }
 0x143   : > { %v425_v12 = vadd.f32 1e-05, %v424_v11 }
 0x145   : > { %2127 = vrsqrt.f32 %v425_v12 }
 0x14f   : > { %v2128_v13 = vpop.eup %2127 }
 0x150   : > { %v427_v15 = vmul.f32 %v2128_v13, %v419_v4 }
 0x152   : > { %v434_v17 = vmul.f32 %v1891_v14, %v427_v15 }
 0x154   : > { %v441_v18 = vadd.f32 %v1892_v16, %v434_v17 }
 0x156   : > { %v442_v19 = vpack.c.bf16 %v441_v18, %v441_v18 }
 0x158   : > { %1974 = vmatmul.mubr.msk.bf16.vlgmr.msra.gmra.mrb[0].mxu0 %vm413_vm0, %v442_v19 }
 0x159   : > { %1979 = vmatprep.mubr.msk.bf16.mxu0 %vm2212_vm1, %v2211_v8 }
 0x22b   : > { %v2372_v20 = vpop.f32.mrb[0].mxu0 }
 0x22c   : > { %509 = vrot.lane.b32.xlu0 %v2372_v20, %s2213_s19  ;;  %503 = vrot.lane.b32.xlu1 %v2372_v20, %s2214_s20  ;;  %v1975_v21 = vpop.f32.mrb[1].mxu0  ;;  %s2221_s19 = smov 16   ;;  %s2222_s20 = smov 8  }
 0x22d   : > { %v499_v22 = vpop.f32.mrb[2].mxu0 }
 0x22e   : > { %v1976_v23 = vpop.f32.mrb[3].mxu0 }
 0x230   : > { %506 = vrot.lane.b32.xlu1 %v2372_v20, %s2215_s26  ;;  %s2223_s26 = smov 24  }
 0x234   : > { %652 = vrot.lane.b32.xlu1 %v2372_v20, %s2216_s28 }
 0x29e   : > { %v2378_v24 = vpop.permute.xlu1 %503  ;;  %v2384_v26 = vpop.permute.xlu0 %509 }
 0x29f   : > { %654 = vrot.lane.b32.xlu1 %v2378_v24, %s2216_s28  ;;  %v528_v38 = vcombine.low %v2378_v24, %v2384_v26  ;;  %v529_v39 = vcombine.high %v2378_v24, %v2384_v26 }
 0x2a1   : > { %v536_v44 = vrot.slane %v528_v38, %v2395_v37  ;;  %v543_v45 = vrot.slane %v529_v39, %v2395_v37 }
 0x2a2   : > { %v2381_v25 = vpop.permute.xlu1 %506 }
 0x2a3   : > { %656 = vrot.lane.b32.xlu1 %v2381_v25, %s2216_s28  ;;  %v512_v35 = vcombine.low %v2372_v20, %v2381_v25  ;;  %v513_v36 = vcombine.high %v2372_v20, %v2381_v25 }
 0x2a5   : > { %v520_v42 = vrot.slane %v512_v35, %v2395_v37  ;;  %v527_v43 = vrot.slane %v513_v36, %v2395_v37 }
 0x2a6   : > { %v653_v32 = vpop.permute.xlu1 %652 }
 0x2a7   : > { %658 = vrot.lane.b32.xlu1 %v2384_v26, %s2216_s28  ;;  %v544_v48 = vcombine.low %v520_v42, %v536_v44  ;;  %v545_v49 = vcombine.high %v520_v42, %v536_v44  ;;  %v560_v50 = vcombine.low %v527_v43, %v543_v45  ;;  %v561_v51 = vcombine.high %v527_v43, %v543_v45 }
 0x2a9   : > { %v552_v57 = vrot.slane %v544_v48, %v2406_v47  ;;  %v559_v58 = vrot.slane %v545_v49, %v2406_v47  ;;  %v568_v59 = vrot.slane %v560_v50, %v2406_v47  ;;  %v575_v60 = vrot.slane %v561_v51, %v2406_v47 }
 0x2ab   : > { %v580_v6 = vcombine.low %v552_v57, %v559_v58  ;;  %v1896_v7 = vcombine.high %v552_v57, %v559_v58  ;;  %v596_v9 = vcombine.low %v568_v59, %v575_v60  ;;  %v1897_v10 = vcombine.high %v568_v59, %v575_v60 }
 0x2ad   : > { %v587_v19 = vrot.slane %v580_v6, %v2395_v37  ;;  %v595_v21 = vrot.slane %v1896_v7, %v2395_v37  ;;  %v603_v22 = vrot.slane %v596_v9, %v2395_v37  ;;  %v611_v23 = vrot.slane %v1897_v10, %v2395_v37 }
 0x2ae   : > { %v959_v9 = vand.u32 127, %v517_v29  ;;  %v2219_v10 = vmov -1e+30  }
 0x2af   : > { %v612_v38 = vcombine.low %v587_v19, %v595_v21  ;;  %v628_v39 = vcombine.low %v603_v22, %v611_v23  ;;  %v629_v41 = vcombine.high %v603_v22, %v611_v23 }
 0x2b0   : > { %vm960_vm3 = vcmp.ge.s32.totalorder %v2388_v31, %v959_v9 }
 0x2b1   : > { %v620_v49 = vrot.slane %v612_v38, %v2406_v47  ;;  %v636_v50 = vrot.slane %v628_v39, %v2406_v47 }
 0x2b3   : > { %v644_v58 = vcombine.low %v620_v49, %v636_v50 }
 0x311   : > { %v655_v40 = vpop.permute.xlu1 %654 }
 0x315   : > { %v657_v46 = vpop.permute.xlu1 %656 }
 0x316   : > { %v664_v52 = vcombine.low %v653_v32, %v657_v46  ;;  %v665_v53 = vcombine.high %v653_v32, %v657_v46 }
 0x318   : > { %v672_v61 = vrot.slane %v664_v52, %v2395_v37  ;;  %v679_v62 = vrot.slane %v665_v53, %v2395_v37 }
 0x319   : > { %v659_v54 = vpop.permute.xlu1 %658 }
 0x31a   : > { %v680_v55 = vcombine.low %v655_v40, %v659_v54  ;;  %v681_v56 = vcombine.high %v655_v40, %v659_v54  ;;  %v613_v40 = vcombine.high %v587_v19, %v595_v21  ;;  %v643_v54 = vrot.slane %v629_v41, %v2406_v47 }
 0x31c   : > { %v688_v63 = vrot.slane %v680_v55, %v2395_v37  ;;  %v695_v1 = vrot.slane %v681_v56, %v2395_v37  ;;  %v627_v53 = vrot.slane %v613_v40, %v2406_v47 }
 0x31e   : > { %v696_v2 = vcombine.low %v672_v61, %v688_v63  ;;  %v697_v3 = vcombine.high %v672_v61, %v688_v63  ;;  %v712_v4 = vcombine.low %v679_v62, %v695_v1  ;;  %v713_v5 = vcombine.high %v679_v62, %v695_v1 }
 0x31f   : > { %v646_v59 = vcombine.low %v627_v53, %v643_v54  ;;  %v648_v61 = vpack.c.bf16 %v644_v58, %v644_v58  ;;  %v647_v6 = vcombine.high %v627_v53, %v643_v54 }
 0x320   : > { %v704_v11 = vrot.slane %v696_v2, %v2406_v47  ;;  %v711_v12 = vrot.slane %v697_v3, %v2406_v47  ;;  %v720_v13 = vrot.slane %v712_v4, %v2406_v47  ;;  %v727_v14 = vrot.slane %v713_v5, %v2406_v47 }
 0x321   : > { %v650_v62 = vpack.c.bf16 %v646_v59, %v646_v59  ;;  %v645_v2 = vcombine.high %v620_v49, %v636_v50  ;;  %v651_v7 = vpack.c.bf16 %v647_v6, %v647_v6 }
 0x322   : > { %v732_v15 = vcombine.low %v704_v11, %v711_v12  ;;  %v1898_v16 = vcombine.high %v704_v11, %v711_v12  ;;  %v748_v17 = vcombine.low %v720_v13, %v727_v14  ;;  %v1899_v18 = vcombine.high %v720_v13, %v727_v14 }
 0x323   : > { %v649_v4 = vpack.c.bf16 %v645_v2, %v645_v2  ;;  %v961_v11 = vsel %vm960_vm3, 0.0, %v2219_v10 }
 0x324   : > { %v739_v27 = vrot.slane %v732_v15, %v2395_v37  ;;  %v747_v28 = vrot.slane %v1898_v16, %v2395_v37  ;;  %v755_v30 = vrot.slane %v748_v17, %v2395_v37  ;;  %v763_v32 = vrot.slane %v1899_v18, %v2395_v37 }
 0x326   : > { %v764_v33 = vcombine.low %v739_v27, %v747_v28  ;;  %v780_v34 = vcombine.low %v755_v30, %v763_v32  ;;  %v765_v35 = vcombine.high %v739_v27, %v747_v28  ;;  %v781_v36 = vcombine.high %v755_v30, %v763_v32 }
 0x328   : > { %v772_v42 = vrot.slane %v764_v33, %v2406_v47  ;;  %v788_v43 = vrot.slane %v780_v34, %v2406_v47  ;;  %v779_v44 = vrot.slane %v765_v35, %v2406_v47  ;;  %v795_v45 = vrot.slane %v781_v36, %v2406_v47 }
 0x32a   : > { %v796_v46 = vcombine.low %v772_v42, %v788_v43  ;;  %v798_v48 = vcombine.low %v779_v44, %v795_v45  ;;  %v797_v57 = vcombine.high %v772_v42, %v788_v43  ;;  %v799_v1 = vcombine.high %v779_v44, %v795_v45 }
 0x32c   : > { %v800_v51 = vpack.c.bf16 %v796_v46, %v796_v46  ;;  %v802_v52 = vpack.c.bf16 %v798_v48, %v798_v48  ;;  %v801_v60 = vpack.c.bf16 %v797_v57, %v797_v57  ;;  %v803_v3 = vpack.c.bf16 %v799_v1, %v799_v1 }
 0x32e   : > { %v967_v55 = vsel %vm962_vm2, %v800_v51, 0  ;;  %v1059_v56 = vsel %vm962_vm2, %v802_v52, 0  ;;  %v1013_v63 = vsel %vm962_vm2, %v801_v60, 0  ;;  %v1105_v5 = vsel %vm962_vm2, %v803_v3, 0 }
 0x32f   : > { %1978 = vmatpush3.bf16.xpose.msra.mxu0 %v967_v55  ;;  %1990 = vmatpush3.bf16.xpose.msra.mxu1 %v1059_v56 }
 0x330   : > { %1983 = vmatprep.subr.bf16.mxu0 %v2211_v8  ;;  %2001 = vmatprep.subr.bf16.mxu1 %v2211_v8 }
 0x336   : > { %1980 = vmatmul.mubr.msk.bf16.vlgmr.msra.gmra.mrb[4].mxu0 %vm962_vm2, %v648_v61  ;;  %1992 = vmatmul.mubr.msk.bf16.vlgmr.msra.gmra.mrb[0].mxu1 %vm962_vm2, %v650_v62 }
 0x337   : > { %1984 = vmatpush3.bf16.xpose.msra.mxu0 %v1013_v63  ;;  %1985 = vmatprep.mubr.msk.bf16.mxu0 %vm2212_vm1, %v2211_v8 }
 0x338   : > { %1995 = vmatprep.subr.bf16.mxu0 %v2211_v8  ;;  %2003 = vmatprep.mubr.msk.bf16.mxu1 %vm2212_vm1, %v2211_v8 }
 0x33e   : > { %1986 = vmatmul.mubr.msk.bf16.vlgmr.msra.gmra.mrb[8].mxu0 %vm962_vm2, %v649_v4 }
 0x33f   : > { %1996 = vmatpush3.bf16.xpose.msra.mxu0 %v1105_v5  ;;  %1997 = vmatprep.mubr.msk.bf16.mxu0 %vm2212_vm1, %v2211_v8 }
 0x340   : > { %2007 = vmatprep.subr.bf16.mxu0 %v2211_v8 }
 0x346   : > { %1998 = vmatmul.mubr.msk.bf16.vlgmr.msra.gmra.mrb[12].mxu0 %vm962_vm2, %v651_v7 }
 0x347   : > { %2009 = vmatprep.mubr.msk.bf16.mxu0 %vm2212_vm1, %v2211_v8 }
 0x409   : > { %v1003_v12 = vpop.f32.mrb[4].mxu0  ;;  %v1095_v13 = vpop.f32.mrb[0].mxu1 }
 0x40a   : > { %v1004_v14 = vadd.f32 %v1003_v12, %v961_v11  ;;  %v1981_v15 = vpop.f32.mrb[5].mxu0  ;;  %v1993_v16 = vpop.f32.mrb[1].mxu1  ;;  %v1096_v19 = vadd.f32 %v1095_v13, %v961_v11 }
 0x40b   : > { %v1006_v17 = vpop.f32.mrb[6].mxu0  ;;  %v1098_v18 = vpop.f32.mrb[2].mxu1 }
 0x40c   : > { %v1982_v21 = vpop.f32.mrb[7].mxu0  ;;  %v1994_v22 = vpop.f32.mrb[3].mxu1  ;;  %v1147_v23 = vsel %vm962_vm2, %v1004_v14, -inf  ;;  %v1153_v27 = vsel %vm962_vm2, %v1096_v19, -inf }
 0x40d   : > { %1148 = vmax.xlane.f32.xlu1 %v1147_v23 }
 0x411   : > { %1154 = vmax.xlane.f32.xlu1 %v1153_v27  ;;  %v1049_v29 = vpop.f32.mrb[8].mxu0 }
 0x412   : > { %v1050_v31 = vadd.f32 %v1049_v29, %v961_v11  ;;  %v1987_v28 = vpop.f32.mrb[9].mxu0 }
 0x413   : > { %v1052_v30 = vpop.f32.mrb[10].mxu0 }
 0x414   : > { %v1988_v32 = vpop.f32.mrb[11].mxu0  ;;  %v1150_v33 = vsel %vm962_vm2, %v1050_v31, -inf }
 0x415   : > { %1151 = vmax.xlane.f32.xlu0 %v1150_v33 }
 0x419   : > { %v1141_v34 = vpop.f32.mrb[12].mxu0 }
 0x41a   : > { %v1142_v35 = vadd.f32 %v1141_v34, %v961_v11  ;;  %v1999_v36 = vpop.f32.mrb[13].mxu0 }
 0x41b   : > { %v1144_v38 = vpop.f32.mrb[14].mxu0 }
 0x41c   : > { %v2000_v39 = vpop.f32.mrb[15].mxu0  ;;  %v1156_v40 = vsel %vm962_vm2, %v1142_v35, -inf }
 0x41d   : > { %1157 = vmax.xlane.f32.xlu0 %v1156_v40 }
 0x422   : > { %804 = vrot.lane.b32.xlu1 %v2372_v20, %s2220_s29 }
 0x49a   : > { %v1149_v41 = vpop.xlane.xlu1 %1148 }
 0x49b   : > { %v1159_v42 = vsub.f32 %v1004_v14, %v1149_v41 }
 0x49d   : > { %v1163_v43 = vmul.f32 1.442695, %v1159_v42 }
 0x49e   : > { %v1155_v53 = vpop.xlane.xlu1 %1154 }
 0x49f   : > { %2129 = vpow2.f32 %v1163_v43  ;;  %v1161_v54 = vsub.f32 %v1096_v19, %v1155_v53 }
 0x4a1   : > { %v1167_v56 = vmul.f32 1.442695, %v1161_v54 }
 0x4a2   : > { %v1152_v44 = vpop.xlane.xlu0 %1151 }
 0x4a3   : > { %v1160_v45 = vsub.f32 %v1050_v31, %v1152_v44 }
 0x4a5   : > { %v1165_v46 = vmul.f32 1.442695, %v1160_v45 }
 0x4a7   : > { %2131 = vpow2.f32 %v1165_v46 }
 0x4a9   : > { %v2463_v48 = vpop.eup %2129 }
 0x4aa   : > { %v1171_v49 = vsel %vm962_vm2, %v2463_v48, 0.0  ;;  %v1158_v20 = vpop.xlane.xlu0 %1157 }
 0x4ab   : > { %1172 = vadd.xlane.f32.xlu1 %v1171_v49  ;;  %v1162_v52 = vsub.f32 %v1142_v35, %v1158_v20 }
 0x4ad   : > { %v1169_v55 = vmul.f32 1.442695, %v1162_v52 }
 0x4af   : > { %2133 = vpow2.f32 %v1169_v55 }
 0x4b0   : > { %2135 = vpow2.f32 %v1167_v56 }
 0x4b1   : > { %v2467_v50 = vpop.eup %2131 }
 0x4b2   : > { %v1174_v51 = vsel %vm962_vm2, %v2467_v50, 0.0 }
 0x4b3   : > { %1175 = vadd.xlane.f32.xlu0 %v1174_v51 }
 0x4b9   : > { %v2474_v57 = vpop.eup %2133 }
 0x4ba   : > { %v1180_v58 = vsel %vm962_vm2, %v2474_v57, 0.0  ;;  %v2478_v59 = vpop.eup %2135 }
 0x4bc   : > { %808 = vrot.lane.b32.xlu1 %v2381_v25, %s2220_s29  ;;  %v1177_v25 = vsel %vm962_vm2, %v2478_v59, 0.0 }
 0x4c0   : > { %810 = vrot.lane.b32.xlu1 %v2384_v26, %s2220_s29 }
 0x4c9   : > { %806 = vrot.lane.b32.xlu0 %v2378_v24, %s2220_s29  ;;  %v805_v24 = vpop.permute.xlu1 %804  ;;  %s402_s29 = sand.u32 1, %s2201_s22  }
 0x4ca   : > { %s1889_s15 = sshll.u32 %s402_s29, 3  ;;  %s1813_s25 = scalar_lea.sflag [#allocation3], %s402_s29 }
 0x4e4   : > { %1181 = vadd.xlane.f32.xlu1 %v1180_v58 }
 0x4e8   : > { %1178 = vadd.xlane.f32.xlu0 %v1177_v25 }
 0x538   : > { %v1173_v26 = vpop.xlane.xlu1 %1172 }
 0x539   : > { %2137 = vrcp.f32 %v1173_v26 }
 0x53c   : > { %v809_v60 = vpop.permute.xlu1 %808 }
 0x53d   : > { %v816_v62 = vcombine.low %v805_v24, %v809_v60  ;;  %v817_v63 = vcombine.high %v805_v24, %v809_v60 }
 0x53f   : > { %v824_v5 = vrot.slane %v816_v62, %v2395_v37  ;;  %v831_v6 = vrot.slane %v817_v63, %v2395_v37 }
 0x540   : > { %v1176_v61 = vpop.xlane.xlu0 %1175  ;;  %v811_v1 = vpop.permute.xlu1 %810 }
 0x541   : > { %2139 = vrcp.f32 %v1176_v61 }
 0x543   : > { %v2138_v34 = vpop.eup %2137 }
 0x544   : > { %v807_v2 = vpop.permute.xlu0 %806  ;;  %v1187_v45 = vmul.f32 %v2138_v34, %v2463_v48 }
 0x545   : > { %v832_v3 = vcombine.low %v807_v2, %v811_v1  ;;  %v833_v4 = vcombine.high %v807_v2, %v811_v1 }
 0x546   : > { %v1191_v55 = vpack.c.bf16 %v1187_v45, %v1187_v45 }
 0x547   : > { %v840_v7 = vrot.slane %v832_v3, %v2395_v37  ;;  %v847_v9 = vrot.slane %v833_v4, %v2395_v37 }
 0x549   : > { %v848_v10 = vcombine.low %v824_v5, %v840_v7  ;;  %v849_v11 = vcombine.high %v824_v5, %v840_v7  ;;  %v864_v12 = vcombine.low %v831_v6, %v847_v9  ;;  %v865_v13 = vcombine.high %v831_v6, %v847_v9 }
 0x54b   : > { %v856_v14 = vrot.slane %v848_v10, %v2406_v47  ;;  %v863_v15 = vrot.slane %v849_v11, %v2406_v47  ;;  %v872_v16 = vrot.slane %v864_v12, %v2406_v47  ;;  %v879_v17 = vrot.slane %v865_v13, %v2406_v47  ;;  %v2140_v40 = vpop.eup %2139 }
 0x54c   : > { %v1188_v46 = vmul.f32 %v2140_v40, %v2467_v50 }
 0x54d   : > { %v884_v18 = vcombine.low %v856_v14, %v863_v15  ;;  %v1900_v19 = vcombine.high %v856_v14, %v863_v15  ;;  %v900_v21 = vcombine.low %v872_v16, %v879_v17  ;;  %v1901_v22 = vcombine.high %v872_v16, %v879_v17 }
 0x54e   : > { %v1192_v56 = vpack.c.bf16 %v1188_v46, %v1188_v46 }
 0x54f   : > { %v891_v23 = vrot.slane %v884_v18, %v2395_v37  ;;  %v899_v27 = vrot.slane %v1900_v19, %v2395_v37  ;;  %v907_v29 = vrot.slane %v900_v21, %v2395_v37  ;;  %v915_v31 = vrot.slane %v1901_v22, %v2395_v37 }
 0x551   : > { %v916_v28 = vcombine.low %v891_v23, %v899_v27  ;;  %v932_v30 = vcombine.low %v907_v29, %v915_v31  ;;  %v917_v32 = vcombine.high %v891_v23, %v899_v27  ;;  %v933_v33 = vcombine.high %v907_v29, %v915_v31  ;;  %v2115_v29 = vld [vmem:[%s2666_s6] sm:$0xff]  }
 0x553   : > { %v924_v35 = vrot.slane %v916_v28, %v2406_v47  ;;  %v940_v36 = vrot.slane %v932_v30, %v2406_v47  ;;  %v931_v38 = vrot.slane %v917_v32, %v2406_v47  ;;  %v947_v39 = vrot.slane %v933_v33, %v2406_v47 }
 0x555   : > { %v948_v41 = vcombine.low %v924_v35, %v940_v36  ;;  %v949_v42 = vcombine.high %v924_v35, %v940_v36  ;;  %v950_v43 = vcombine.low %v931_v38, %v947_v39  ;;  %v951_v44 = vcombine.high %v931_v38, %v947_v39  ;;  %v2116_v38 = vld [vmem:[%s2666_s6 + $0x8] sm:$0xff]  }
 0x557   : > { %v952_v49 = vpack.c.bf16 %v948_v41, %v948_v41  ;;  %v953_v51 = vpack.c.bf16 %v949_v42, %v949_v42  ;;  %v954_v53 = vpack.c.bf16 %v950_v43, %v950_v43  ;;  %v955_v54 = vpack.c.bf16 %v951_v44, %v951_v44 }
 0x559   : > { %v1200_v20 = vsel %vm1198_vm4, %v952_v49, 0  ;;  %v1246_v52 = vsel %vm1198_vm4, %v953_v51, 0  ;;  %v1292_v48 = vsel %vm1198_vm4, %v954_v53, 0  ;;  %v1338_v50 = vsel %vm1198_vm4, %v955_v54, 0 }
 0x55a   : > { %2002 = vmatpush3.bf16.msra.mxu1 %v1200_v20  ;;  %2008 = vmatpush3.bf16.msra.mxu0 %v1246_v52 }
 0x55b   : > { %2013 = vmatprep.subr.bf16.mxu1 %v2211_v8  ;;  %2019 = vmatprep.subr.bf16.mxu0 %v2211_v8 }
 0x55d   : > { %2004 = vmatmul.mubr.msk.bf16.vlgmr.msra.gmra.mrb[4].mxu1 %vm962_vm2, %v1191_v55  ;;  %2010 = vmatmul.mubr.msk.bf16.vlgmr.msra.gmra.mrb[16].mxu0 %vm962_vm2, %v1192_v56 }
 0x55e   : > { %2014 = vmatpush3.bf16.msra.mxu1 %v1292_v48  ;;  %2020 = vmatpush3.bf16.msra.mxu0 %v1338_v50 }
 0x55f   : > { %2021 = vmatprep.mubr.msk.bf16.mxu0 %vm2212_vm1, %v2211_v8  ;;  %2015 = vmatprep.mubr.msk.bf16.mxu1 %vm2212_vm1, %v2211_v8 }
 0x560   : > { %2025 = vmatprep.subr.bf16.mxu1 %v2211_v8  ;;  %2033 = vmatprep.subr.bf16.mxu0 %v2211_v8 }
 0x571   : > { %v1182_v58 = vpop.xlane.xlu1 %1181 }
 0x572   : > { %2141 = vrcp.f32 %v1182_v58 }
 0x575   : > { %v1179_v25 = vpop.xlane.xlu0 %1178 }
 0x576   : > { %2143 = vrcp.f32 %v1179_v25 }
 0x57c   : > { %v2142_v24 = vpop.eup %2141 }
 0x57d   : > { %v1190_v26 = vmul.f32 %v2142_v24, %v2474_v57 }
 0x57f   : > { %v1194_v60 = vpack.c.bf16 %v1190_v26, %v1190_v26 }
 0x580   : > { %v2144_v61 = vpop.eup %2143 }
 0x581   : > { %v1189_v62 = vmul.f32 %v2144_v61, %v2478_v59  ;;  %2022 = vmatmul.mubr.msk.bf16.vlgmr.msra.gmra.mrb[20].mxu0 %vm962_vm2, %v1194_v60 }
 0x582   : > { %2037 = vmatprep.mubr.msk.bf16.mxu0 %vm2212_vm1, %v2211_v8 }
 0x583   : > { %v1193_v63 = vpack.c.bf16 %v1189_v62, %v1189_v62 }
 0x585   : > { %2016 = vmatmul.mubr.msk.bf16.vlgmr.msra.gmra.mrb[8].mxu1 %vm962_vm2, %v1193_v63  ;;  %v1912_v63 = vld [vmem:[%s2667_s7] ss:$0 sm:$0xff] }
 0x586   : > { %2029 = vmatprep.mubr.msk.bf16.mxu1 %vm2212_vm1, %v2211_v8  ;;  %2026 = vmatpush3.bf16.msra.mxu1 %v2115_v29 }
 0x587   : > { %2027 = vmatprep.subr.bf16.mxu1 %v2211_v8 }
 0x58a   : > { %2028 = vmatpush3.bf16.msra.mxu1 %v2116_v38 }
 0x58b   : > { %2041 = vmatprep.subr.bf16.mxu1 %v2211_v8 }
 0x630   : > { %v1236_v1 = vpop.f32.mrb[4].mxu1  ;;  %v1282_v2 = vpop.f32.mrb[16].mxu0 }
 0x631   : > { %v2005_v3 = vpop.f32.mrb[5].mxu1  ;;  %v2011_v4 = vpop.f32.mrb[17].mxu0 }
 0x632   : > { %v1239_v57 = vpop.f32.mrb[6].mxu1  ;;  %v1285_v5 = vpop.f32.mrb[18].mxu0 }
 0x633   : > { %v2006_v6 = vpop.f32.mrb[7].mxu1  ;;  %v2012_v7 = vpop.f32.mrb[19].mxu0 }
 0x654   : > { %v1374_v59 = vpop.f32.mrb[20].mxu0 }
 0x655   : > { %v1396_v9 = vcombine.low %v1282_v2, %v1374_v59  ;;  %v1397_v10 = vcombine.high %v1282_v2, %v1374_v59  ;;  %v2023_v11 = vpop.f32.mrb[21].mxu0 }
 0x656   : > { %v1377_v12 = vpop.f32.mrb[22].mxu0 }
 0x657   : > { %v2024_v13 = vpop.f32.mrb[23].mxu0  ;;  %v1404_v19 = vrot.slane %v1396_v9, %v2395_v37  ;;  %v1411_v21 = vrot.slane %v1397_v10, %v2395_v37  ;;  %v2117_v12 = vld [vmem:[%s2668_s8] sm:$0xff]  }
 0x658   : > { %v1328_v14 = vpop.f32.mrb[8].mxu1  ;;  %2034 = vmatpush3.bf16.msra.mxu0 %v2117_v12  ;;  %v2119_v13 = vld [vmem:[%s2670_s10] sm:$0xff]  }
 0x659   : > { %v1380_v15 = vcombine.low %v1236_v1, %v1328_v14  ;;  %v1381_v16 = vcombine.high %v1236_v1, %v1328_v14  ;;  %v2017_v17 = vpop.f32.mrb[9].mxu1  ;;  %2035 = vmatprep.subr.bf16.mxu0 %v2211_v8  ;;  %v2120_v14 = vld [vmem:[%s2670_s10 + $0x8] sm:$0xff]  }
 0x65a   : > { %v1331_v18 = vpop.f32.mrb[10].mxu1  ;;  %v2123_v17 = vld [vmem:[%s2670_s10 + $0x20] sm:$0xff]  }
 0x65b   : > { %v1388_v22 = vrot.slane %v1380_v15, %v2395_v37  ;;  %v1395_v23 = vrot.slane %v1381_v16, %v2395_v37  ;;  %v2018_v27 = vpop.f32.mrb[11].mxu1  ;;  %v2121_v15 = vld [vmem:[%s2670_s10 + $0x10] sm:$0xff]   ;;  %v2122_v16 = vld [vmem:[%s2670_s10 + $0x18] sm:$0xff]   ;;  %v2124_v18 = vld [vmem:[%s2670_s10 + $0x28] sm:$0xff]  }
 0x65c   : > { %v1916_v27 = vld [vmem:[%s2663_s3] ss:$0 sm:$0xff] }
 0x65d   : > { %v1412_v31 = vcombine.low %v1388_v22, %v1404_v19  ;;  %v1413_v28 = vcombine.high %v1388_v22, %v1404_v19  ;;  %v1428_v30 = vcombine.low %v1395_v23, %v1411_v21  ;;  %v1429_v32 = vcombine.high %v1395_v23, %v1411_v21 }
 0x65f   : > { %v1420_v33 = vrot.slane %v1412_v31, %v2406_v47  ;;  %v1427_v34 = vrot.slane %v1413_v28, %v2406_v47  ;;  %v1436_v35 = vrot.slane %v1428_v30, %v2406_v47  ;;  %v1443_v36 = vrot.slane %v1429_v32, %v2406_v47  ;;  %v1917_v31 = vld [vmem:[%s2664_s4] ss:$0 sm:$0xff] }
 0x661   : > { %v1448_v39 = vcombine.low %v1420_v33, %v1427_v34  ;;  %v1910_v40 = vcombine.high %v1420_v33, %v1427_v34  ;;  %v1464_v41 = vcombine.low %v1436_v35, %v1443_v36  ;;  %v1911_v42 = vcombine.high %v1436_v35, %v1443_v36  ;;  %v2125_v33 = vld [vmem:[%s2670_s10 + $0x30] sm:$0xff]   ;;  %v2126_v34 = vld [vmem:[%s2670_s10 + $0x38] sm:$0xff]   ;;  %v1918_v35 = vld [vmem:[%s2669_s9] ss:$0 sm:$0xff] }
 0x663   : > { %v1455_v43 = vrot.slane %v1448_v39, %v2395_v37  ;;  %v1463_v44 = vrot.slane %v1910_v40, %v2395_v37  ;;  %v1471_v45 = vrot.slane %v1464_v41, %v2395_v37  ;;  %v1479_v46 = vrot.slane %v1911_v42, %v2395_v37 }
 0x665   : > { %v1481_v49 = vcombine.high %v1455_v43, %v1463_v44  ;;  %v1497_v51 = vcombine.high %v1471_v45, %v1479_v46  ;;  %v1480_v20 = vcombine.low %v1455_v43, %v1463_v44  ;;  %v1496_v52 = vcombine.low %v1471_v45, %v1479_v46 }
 0x667   : > { %v1495_v53 = vrot.slane %v1481_v49, %v2406_v47  ;;  %v1511_v54 = vrot.slane %v1497_v51, %v2406_v47  ;;  %v1488_v55 = vrot.slane %v1480_v20, %v2406_v47  ;;  %v1504_v56 = vrot.slane %v1496_v52, %v2406_v47 }
 0x669   : > { %v1514_v48 = vcombine.low %v1495_v53, %v1511_v54  ;;  %v1513_v50 = vcombine.high %v1488_v55, %v1504_v56  ;;  %v1515_v58 = vcombine.high %v1495_v53, %v1511_v54  ;;  %v1512_v25 = vcombine.low %v1488_v55, %v1504_v56 }
 0x66b   : > { %1521 = vrot.lane.b32.xlu1 %v1514_v48, %s2221_s19  ;;  %1517 = vrot.lane.b32.xlu0 %v1513_v50, %s2222_s20  ;;  %s404_s19 = scalar_lea.vmem [#allocation2], %s1889_s15 }
 0x66c   : > { %s1826_s20 = sshll.u32 %s404_s19, 4  ;;  %s2619_s20 = int_to_ptr.vmem [resolvable:$true] %s1826_s20 }
 0x66d   : > { %s2147_s15 = scalar_lea.vmem %s2619_s20, 128  ;;  %p2154_p0 = scmp.lt.s32.totalorder %s2619_s20, %s2152_s17 }
 0x66e   : > { %p2148_p11 = scmp.ne.s32.totalorder %s2619_s20, %s2147_s15  ;;  %p2155_p1 = scmp.lt.s32.totalorder %s2153_s1, %s2147_s15 }
 0x66f   : > { %1525 = vrot.lane.b32.xlu0 %v1515_v58, %s2223_s26 }
 0x670   : > { %p2149_p12 = pnand %p2148_p11, %p2328_p5  ;;  %p2156_p2 = por %p2155_p1, %p2154_p0 }
 0x672   : > { %p2150_p13 = pneg %p2149_p12 }
 0x674   : > { %p2157_p3 = pnand %p2156_p2, %p2150_p13 }
 0x6dd   : > { %v1518_v37 = vpop.permute.xlu0 %1517  ;;  %v1522_v24 = vpop.permute.xlu1 %1521 }
 0x6de   : > { %v1528_v26 = vsel %vm962_vm2, %v1512_v25, %v1518_v37 }
 0x6df   : > { %v1530_v61 = vsel %vm1529_vm5, %v1528_v26, %v1522_v24 }
 0x6e1   : > { %v1526_v60 = vpop.permute.xlu0 %1525 }
 0x6e2   : > { %v1532_v62 = vsel %vm1531_vm6, %v1530_v61, %v1526_v60 }
 0x6e3   : > { %v1533_v47 = vpack.c.bf16 %v1532_v62, %v1532_v62 }
 0x6e5   : > { %2030 = vmatmul.mubr.msk.bf16.vlgmr.msra.gmra.mrb[12].mxu1 %vm413_vm0, %v1533_v47 }
 0x6e6   : > { %2057 = vmatprep.mubr.msk.bf16.mxu1 %vm2212_vm1, %v2211_v8  ;;  %2042 = vmatpush3.bf16.msra.mxu1 %v2119_v13 }
 0x6e7   : > { %2043 = vmatprep.subr.bf16.mxu1 %v2211_v8 }
 0x6ea   : > { %2044 = vmatpush3.bf16.msra.mxu1 %v2120_v14 }
 0x6eb   : > { %2045 = vmatprep.subr.bf16.mxu1 %v2211_v8 }
 0x6ee   : > { %2046 = vmatpush3.bf16.msra.mxu1 %v2121_v15 }
 0x6ef   : > { %2047 = vmatprep.subr.bf16.mxu1 %v2211_v8 }
 0x6f2   : > { %2048 = vmatpush3.bf16.msra.mxu1 %v2122_v16 }
 0x6f3   : > { %2049 = vmatprep.subr.bf16.mxu1 %v2211_v8 }
 0x6f6   : > { %2050 = vmatpush3.bf16.msra.mxu1 %v2123_v17 }
 0x6f7   : > { %2051 = vmatprep.subr.bf16.mxu1 %v2211_v8 }
 0x6fa   : > { %2052 = vmatpush3.bf16.msra.mxu1 %v2124_v18 }
 0x6fb   : > { %2053 = vmatprep.subr.bf16.mxu1 %v2211_v8 }
 0x6fe   : > { %2054 = vmatpush3.bf16.msra.mxu1 %v2125_v33 }
 0x6ff   : > { %2055 = vmatprep.subr.bf16.mxu1 %v2211_v8  ;;  %v1922_v8 = vld [vmem:[%s2671_s11] ss:$0 sm:$0xff] }
 0x702   : > { %2056 = vmatpush3.bf16.msra.mxu1 %v2126_v34 }
 0x7b8   : > { %v1594_v1 = vpop.f32.mrb[12].mxu1 }
 0x7b9   : > { %v1595_v2 = vadd.f32 %v1912_v63, %v1594_v1  ;;  %v2031_v3 = vpop.f32.mrb[13].mxu1 }
 0x7ba   : > { %v1597_v4 = vpop.f32.mrb[14].mxu1 }
 0x7bb   : > { %v2554_v57 = vadd.f32 %v1595_v2, %v2343_v0  ;;  %v2032_v5 = vpop.f32.mrb[15].mxu1  ;;  %v2118_v0 = vld [vmem:[%s2668_s8 + $0x8] sm:$0xff]  }
 0x7bc   : > { %2036 = vmatpush3.bf16.msra.mxu0 %v2118_v0 }
 0x7bd   : > { %v1603_v6 = vsel %vm413_vm0, %v2554_v57, 0.0 }
 0x7be   : > { %1604 = vadd.xlane.f32.xlu1 %v1603_v6 }
 0x84b   : > { %v1605_v7 = vpop.xlane.xlu1 %1604 }
 0x84c   : > { %v1606_v59 = vmul.f32 0.03125, %v1605_v7 }
 0x84e   : > { %v1607_v9 = vsub.f32 %v2554_v57, %v1606_v59 }
 0x850   : > { %v1608_v10 = vmul.f32 %v1607_v9, %v1607_v9 }
 0x852   : > { %v1609_v11 = vsel %vm413_vm0, %v1608_v10, 0.0 }
 0x853   : > { %1610 = vadd.xlane.f32.xlu0 %v1609_v11 }
 0x8e0   : > { %v1611_v19 = vpop.xlane.xlu0 %1610 }
 0x8e1   : > { %v1612_v21 = vmul.f32 0.03125, %v1611_v19 }
 0x8e3   : > { %v1613_v22 = vadd.f32 1e-05, %v1612_v21 }
 0x8e5   : > { %2145 = vrsqrt.f32 %v1613_v22 }
 0x8ef   : > { %v2146_v23 = vpop.eup %2145 }
 0x8f0   : > { %v1615_v29 = vmul.f32 %v2146_v23, %v1607_v9 }
 0x8f2   : > { %v1622_v28 = vmul.f32 %v1916_v27, %v1615_v29 }
 0x8f4   : > { %v1629_v30 = vadd.f32 %v1917_v31, %v1622_v28 }
 0x8f6   : > { %v1630_v32 = vpack.c.bf16 %v1629_v30, %v1629_v30 }
 0x8f8   : > { %2038 = vmatmul.mubr.msk.bf16.vlgmr.msra.gmra.mrb[24].mxu0 %vm413_vm0, %v1630_v32 }
 0x9cb   : > { %v1691_v36 = vpop.f32.mrb[24].mxu0 }
 0x9cc   : > { %v1692_v38 = vadd.f32 %v1918_v35, %v1691_v36  ;;  %v2039_v39 = vpop.f32.mrb[25].mxu0 }
 0x9cd   : > { %v1694_v40 = vpop.f32.mrb[26].mxu0 }
 0x9ce   : > { %v1697_v41 = vmax.f32 %v1692_v38, 0.0  ;;  %v2040_v42 = vpop.f32.mrb[27].mxu0 }
 0x9d0   : > { %v1698_v43 = vpack.c.bf16 %v1697_v41, %v1697_v41 }
 0x9d2   : > { %2058 = vmatmul.mubr.bf16.vlgmr.msra.gmra.mrb[16].mxu1 %v1698_v43 }
 0xaa5   : > { %v1804_v44 = vpop.f32.mrb[16].mxu1 }
 0xaa6   : > { %v1805_v45 = vadd.f32 %v1922_v8, %v1804_v44  ;;  %v2059_v46 = vpop.f32.mrb[17].mxu1 }
 0xaa7   : > { %v1807_v49 = vpop.f32.mrb[18].mxu1 }
 0xaa8   : > { %v1810_v51 = vadd.f32 %v1805_v45, %v2554_v57  ;;  %v2060_v20 = vpop.f32.mrb[19].mxu1 }
 0xaaa   : > { %1811 = vst.msk [vmem:[%s404_s19] sm:$0xff] %vm413_vm0, %v1810_v51 }
 0xaab   : > { %2160 = shalt.err (!%p2157_p3)
}
 0xaac   : > { %s2161_s29 = scalar_lea.hbm %s2617_s0, 128  ;;  %s2165_s26 = scalar_lea.hbm %s2672_s12, 256 }
 0xaad   : > { %p2162_p4 = scmp.ne.s32.totalorder %s2617_s0, %s2161_s29  ;;  %p2166_p9 = scmp.lt.u32.totalorder %s2617_s0, %s2672_s12 }
 0xaae   : > { %p2167_p10 = scmp.lt.u32.totalorder %s2165_s26, %s2161_s29  ;;  %p2169_p12 = scmp.lt.u32.totalorder %s2161_s29, %s2617_s0 }
 0xaaf   : > { %p2163_p7 = pnand %p2162_p4, %p2328_p5 }
 0xab0   : > { %p2168_p11 = por %p2167_p10, %p2166_p9 }
 0xab1   : > { %p2164_p8 = pneg %p2163_p7 }
 0xab2   : > { %p2170_p13 = por %p2169_p12, %p2168_p11 }
 0xab4   : > { %p2171_p0 = pnand %p2170_p13, %p2164_p8 }
 0xab6   : > { %2174 = shalt.err (!%p2171_p0)
}
 0xab7   : > { %2061 = dma.vmem_to_hbm [thread:$0]  (%p2328_p5), %s2619_s20, 128, %s2617_s0, %s1813_s25  }
 0xab8 PF: > { %p2067_p1 = scmp.ge.s32.totalorder %s2209_s24, 2  ;;  %s1838_s1 = sand.u32 1, %s2197_s21  }
 0xab9   : > { %s1839_s15 = scalar_lea.sflag [#allocation3], %s1838_s1 }
 0xaba   : > { %p2064_p2 = pnand %p2067_p1, %p2332_p6 }
 0xabc   : > { %2192 = dma.done.wait (!%p2064_p2), %s1839_s15, 128  }
 0xabd   : > { %2194 = vsyncadd (!%p2064_p2), %s1839_s15, 4294967168  ;;  %p22_p3 = scmp.ge.s32.totalorder %s2315_s27, 4   ;;  %s2679_s21 = smov %s2201_s22 }
 0xabe   : > { %s2680_s22 = smov %s2205_s23  ;;  %s2681_s23 = smov %s2326_s30 }
 0xabf   : > { %s2682_s24 = smov %s2315_s27  ;;  %24 = sbr.rel (!%p22_p3) target bundleno = 6 (0x6), region = 103 }
 0xac6   :  { %1844 = vsyncpa [#allocation3], 1 }
 0xac7   :  { %1846 = vsyncpa [#allocation3 + $0x1], 1 }

</bundles_post_ra>
